<compile_context>
chip_gen: v7x
topology: tpu7x:2x2x1
jax: 0.10.0
libtpu: 0.0.40
codegen_flags: <defaults>
</compile_context>

<pallas_src>
import functools

import jax
import jax.numpy as jnp
from jax.experimental import pallas as pl
from jax.experimental.pallas import tpu as pltpu

D_MODEL = 512
EPS = 1e-5


# ----------------------------------------------------------------------------- helpers
def _cdiv(a, b):
    return (a + b - 1) // b


def _round_up(n, m):
    return _cdiv(n, m) * m


def _pick_row_tile(rows, row_tile, align):
    """Row tile: <= row_tile, aligned, and small enough that the grid has >= 2
    steps when rows allow it (so v7x megacore actually shards the grid)."""
    tr = min(_round_up(row_tile, align), _round_up(_cdiv(rows, 2), align))
    return max(tr, align)


def _vmem_limit(n_streamed, tr, d, itemsize, extra_bytes=0):
    """Scoped-VMEM ceiling: double-buffered streamed arrays + resident extras."""
    need = 2 * n_streamed * tr * d * itemsize + extra_bytes + (2 << 20)
    return int(min(max(need, 16 << 20), 48 << 20))


def _mix_i32(x):
    """murmur3-style finalizer in int32: logical shifts + wraparound multiplies.
    Cheap VPU-only ops; lowers everywhere (no unsigned types needed)."""
    x = x ^ jax.lax.shift_right_logical(x, 16)
    x = x * jnp.int32(-2048144789)   # 0x85EBCA6B
    x = x ^ jax.lax.shift_right_logical(x, 13)
    x = x * jnp.int32(-1028477387)   # 0xC2B2AE35
    x = x ^ jax.lax.shift_right_logical(x, 16)
    return x


def _prep_norm_params(gamma, beta, p, training):
    """LayerNorm affine params in f32; 1/keep dropout scale folded in (training)."""
    g = gamma.astype(jnp.float32).reshape(1, D_MODEL)
    b = beta.astype(jnp.float32).reshape(1, D_MODEL)
    if training and p > 0.0:
        inv_keep = 1.0 / (1.0 - p)
        g = g * inv_keep
        b = b * inv_keep
    return g, b


# ----------------------------------------------------------------------------- kernel math
def _ln_dropout_residual(x_f32, y_f32, gamma_f32, beta_f32, seed, base, *, p, training):
    """out = x + dropout(LayerNorm(y)); LN matches torch.nn.LayerNorm(d, eps=1e-5).
    The 1/keep scale is already folded into gamma/beta by the wrapper."""
    mean = jnp.mean(y_f32, axis=-1, keepdims=True)
    centered = y_f32 - mean
    var = jnp.mean(centered * centered, axis=-1, keepdims=True)
    out = centered * jax.lax.rsqrt(var + EPS) * gamma_f32 + beta_f32

    if training and p > 0.0:
        keep = 1.0 - p
        d = out.shape[-1]
        # Global element id = base (scalar, from program_id) + local flat index.
        # Mask depends only on (seed, element index) -> independent of tiling.
        r = jax.lax.broadcasted_iota(jnp.int32, out.shape, 0)
        c = jax.lax.broadcasted_iota(jnp.int32, out.shape, 1)
        ctr = base + r * d + c
        bits = _mix_i32(ctr ^ seed)
        bits = bits & jnp.int32(0x7FFFFFFF)          # sign-safe: compare in [0, 2^31)
        thr = jnp.int32(min(int(keep * (2.0 ** 31)), 2 ** 31 - 1))
        out = jnp.where(bits < thr, out, 0.0)

    return x_f32 + out


def _resid_kernel(seed_ref, x_ref, y_ref, g_ref, b_ref, o_ref, *, p, training, row_tile):
    """Fused LN + dropout + residual add over a precomputed sublayer output y."""
    base = pl.program_id(0) * (row_tile * D_MODEL)
    out = _ln_dropout_residual(
        x_ref[...].astype(jnp.float32), y_ref[...].astype(jnp.float32),
        g_ref[...].astype(jnp.float32), b_ref[...].astype(jnp.float32),
        seed_ref[0], base, p=p, training=training)
    o_ref[...] = out.astype(o_ref.dtype)


def _resid_linear_kernel(seed_ref, x_ref, w_ref, wb_ref, g_ref, b_ref, o_ref, *,
                         p, training, row_tile):
    """Fused Linear (bf16 MXU matmul, f32 accumulate) + LN + dropout + residual."""
    base = pl.program_id(0) * (row_tile * D_MODEL)
    x = x_ref[...]
    y = jnp.dot(x.astype(jnp.bfloat16), w_ref[...],
                preferred_element_type=jnp.float32)
    y = y + wb_ref[...].astype(jnp.float32)
    out = _ln_dropout_residual(
        x.astype(jnp.float32), y,
        g_ref[...].astype(jnp.float32), b_ref[...].astype(jnp.float32),
        seed_ref[0], base, p=p, training=training)
    o_ref[...] = out.astype(o_ref.dtype)


# ----------------------------------------------------------------------------- wrappers
def residual_connection(x, sublayer, gamma, beta, *, p=0.1, training=True,
                        seed=0, row_tile=1024):
    """out = x + dropout(LayerNorm(sublayer(x))).

    Generic path: `sublayer` is an arbitrary JAX callable (plain-JAX glue, like
    the arbitrary nn.Module argument in PyTorch); LN + dropout + residual is
    fused in Pallas and streamed from HBM."""
    B, S, D = x.shape
    assert D == D_MODEL
    y = sublayer(x).astype(x.dtype)

    rows = B * S
    itemsize = jnp.dtype(x.dtype).itemsize
    align = 16 if itemsize < 4 else 8            # bf16 packs 2 rows per sublane
    tr = _pick_row_tile(rows, row_tile, align)
    grid = _cdiv(rows, tr)

    x2 = x.reshape(rows, D)
    y2 = y.reshape(rows, D)
    g, b = _prep_norm_params(gamma, beta, p, training)

    kernel = functools.partial(_resid_kernel, p=p, training=training, row_tile=tr)
    out = pl.pallas_call(
        kernel,
        out_shape=jax.ShapeDtypeStruct((rows, D), x.dtype),
        grid_spec=pltpu.PrefetchScalarGridSpec(
            num_scalar_prefetch=1,
            grid=(grid,),
            in_specs=[
                pl.BlockSpec((tr, D), lambda i, s: (i, 0)),   # x
                pl.BlockSpec((tr, D), lambda i, s: (i, 0)),   # sublayer(x)
                pl.BlockSpec((1, D), lambda i, s: (0, 0)),    # gamma (scaled)
                pl.BlockSpec((1, D), lambda i, s: (0, 0)),    # beta  (scaled)
            ],
            out_specs=pl.BlockSpec((tr, D), lambda i, s: (i, 0)),
        ),
        compiler_params=pltpu.CompilerParams(
            dimension_semantics=("parallel",),
            vmem_limit_bytes=_vmem_limit(3, tr, D, itemsize)),
    )(jnp.array([seed], jnp.int32), x2, y2, g, b)
    return out.reshape(B, S, D)


def residual_connection_fused_linear(x, w, w_bias, gamma, beta, *, p=0.1,
                                     training=True, seed=0, row_tile=1024):
    """out = x + dropout(LayerNorm(x @ w + w_bias)) with the Linear sublayer fused
    into the Pallas kernel (bf16 weights resident in VMEM, matmul on the MXU)."""
    B, S, D = x.shape
    assert D == D_MODEL and w.shape == (D, D)

    rows = B * S
    itemsize = jnp.dtype(x.dtype).itemsize
    align = 16 if itemsize < 4 else 8
    tr = _pick_row_tile(rows, row_tile, align)
    grid = _cdiv(rows, tr)

    x2 = x.reshape(rows, D)
    g, b = _prep_norm_params(gamma, beta, p, training)
    w_bf16 = w.astype(jnp.bfloat16)
    wb = w_bias.astype(jnp.float32).reshape(1, D)

    kernel = functools.partial(_resid_linear_kernel, p=p, training=training,
                               row_tile=tr)
    out = pl.pallas_call(
        kernel,
        out_shape=jax.ShapeDtypeStruct((rows, D), x.dtype),
        grid_spec=pltpu.PrefetchScalarGridSpec(
            num_scalar_prefetch=1,
            grid=(grid,),
            in_specs=[
                pl.BlockSpec((tr, D), lambda i, s: (i, 0)),   # x
                pl.BlockSpec((D, D), lambda i, s: (0, 0)),    # w (bf16, resident)
                pl.BlockSpec((1, D), lambda i, s: (0, 0)),    # w bias
                pl.BlockSpec((1, D), lambda i, s: (0, 0)),    # gamma (scaled)
                pl.BlockSpec((1, D), lambda i, s: (0, 0)),    # beta  (scaled)
            ],
            out_specs=pl.BlockSpec((tr, D), lambda i, s: (i, 0)),
        ),
        compiler_params=pltpu.CompilerParams(
            dimension_semantics=("parallel",),
            vmem_limit_bytes=_vmem_limit(2, tr, D, itemsize,
                                         extra_bytes=2 * D * D * 2)),
    )(jnp.array([seed], jnp.int32), x2, w_bf16, wb, g, b)
    return out.reshape(B, S, D)


# ----------------------------------------------------------------------------- reference
def _reference_no_dropout(x, y, gamma, beta):
    y = y.astype(jnp.float32)
    mean = jnp.mean(y, axis=-1, keepdims=True)
    var = jnp.mean((y - mean) ** 2, axis=-1, keepdims=True)
    normed = (y - mean) / jnp.sqrt(var + EPS)
    return x.astype(jnp.float32) + normed * gamma + beta


if __name__ == "__main__":
    key = jax.random.PRNGKey(0)
    k_x, k_w, k_b = jax.random.split(key, 3)

    B, S, D = 2, 8, D_MODEL
    x = jax.random.normal(k_x, (B, S, D), dtype=jnp.float32)

    # LayerNorm affine params (PyTorch default init: weight=1, bias=0).
    gamma = jnp.ones((D,), jnp.float32)
    beta = jnp.zeros((D,), jnp.float32)

    # Deterministic Linear sublayer (stands in for attention/FFN blocks).
    w = jax.random.normal(k_w, (D, D), dtype=jnp.float32) * (1.0 / jnp.sqrt(D))
    bias = jax.random.normal(k_b, (D,), dtype=jnp.float32) * 0.01
    sublayer = lambda t: jnp.einsum("bsd,de->bse", t, w) + bias

    ref = _reference_no_dropout(x, sublayer(x), gamma, beta)

    # 1) Generic path (arbitrary sublayer), dropout off (eval-mode semantics).
    out_eval = residual_connection(x, sublayer, gamma, beta, p=0.0, training=False)
    jax.block_until_ready(out_eval)
    assert jnp.allclose(out_eval, ref, atol=1e-4, rtol=1e-4), "generic path mismatch"

    # 2) Fused-Linear path (bf16 MXU matmul) vs a matching bf16-matmul reference.
    y_bf = jnp.einsum("bsd,de->bse", x.astype(jnp.bfloat16), w.astype(jnp.bfloat16),
                      preferred_element_type=jnp.float32) + bias
    ref_fused = _reference_no_dropout(x, y_bf, gamma, beta)
    out_fused = residual_connection_fused_linear(x, w, bias, gamma, beta,
                                                 p=0.0, training=False)
    jax.block_until_ready(out_fused)
    assert jnp.allclose(out_fused, ref_fused, atol=2e-3, rtol=2e-3), "fused path mismatch"

    # 3) Training mode with dropout p=0.1 (stochastic; RNG stream differs from torch).
    out_train = residual_connection_fused_linear(x, w, bias, gamma, beta,
                                                 p=0.1, training=True, seed=1234)
    jax.block_until_ready(out_train)
    assert out_train.shape == (B, S, D)
    assert bool(jnp.all(jnp.isfinite(out_train)))
    # Dropped positions contribute exactly 0 (beta=0), so out == x there.
    drop_frac = float(jnp.mean((out_train == x).astype(jnp.float32)))
    assert 0.02 < drop_frac < 0.30, f"dropout fraction looks wrong: {drop_frac}"

    # 4) bf16 activations at the HBM boundary (generic path, eval mode).
    x_bf = x.astype(jnp.bfloat16)
    sublayer_bf = lambda t: (jnp.einsum("bsd,de->bse", t.astype(jnp.float32), w)
                             + bias).astype(jnp.bfloat16)
    ref_bf = _reference_no_dropout(x_bf.astype(jnp.float32),
                                   sublayer_bf(x_bf).astype(jnp.float32),
                                   gamma, beta)
    out_bf = residual_connection(x_bf, sublayer_bf, gamma, beta, p=0.0, training=False)
    jax.block_until_ready(out_bf)
    assert out_bf.dtype == jnp.bfloat16
    assert jnp.allclose(out_bf.astype(jnp.float32), ref_bf, atol=5e-2, rtol=5e-2), \
        "bf16 generic path mismatch"

    # TODO(synk): exact bit-parity with torch.nn.Dropout's RNG stream is not
    # reproducible in Pallas; the mask here is a counter-based hash keyed on seed.
    print("KERNEL_OK")
</pallas_src>

<mosaic_0001>
module attributes {stable_mosaic.version = 11 : i64} {
  func.func @_resid_kernel(%arg0: i32, %arg1: memref<1xi32, #tpu.memory_space<smem>>, %arg2: memref<8x512xf32, #tpu.memory_space<vmem>>, %arg3: memref<8x512xf32, #tpu.memory_space<vmem>>, %arg4: memref<1x512xf32, #tpu.memory_space<vmem>>, %arg5: memref<1x512xf32, #tpu.memory_space<vmem>>, %arg6: memref<8x512xf32, #tpu.memory_space<vmem>>) attributes {dimension_semantics = [#tpu.dimension_semantics<parallel>], iteration_bounds = array<i64: 2>, scalar_prefetch = 1 : i64, scratch_operands = 0 : i64, tpu.core_type = #tpu.core_type<tc>, window_params = [{transform_indices = @transform_0, window_bounds = array<i64: 8, 512>}, {transform_indices = @transform_1, window_bounds = array<i64: 8, 512>}, {pipeline_mode = #tpu.pipeline_mode<synchronous>, transform_indices = @transform_2, window_bounds = array<i64: 1, 512>}, {pipeline_mode = #tpu.pipeline_mode<synchronous>, transform_indices = @transform_3, window_bounds = array<i64: 1, 512>}, {transform_indices = @transform_4, window_bounds = array<i64: 8, 512>}]} {
    %c0 = arith.constant 0 : index
    %c0_0 = arith.constant 0 : index
    %0 = vector.load %arg2[%c0, %c0_0] : memref<8x512xf32, #tpu.memory_space<vmem>>, vector<8x512xf32>
    %c0_1 = arith.constant 0 : index
    %c0_2 = arith.constant 0 : index
    %1 = vector.load %arg3[%c0_1, %c0_2] : memref<8x512xf32, #tpu.memory_space<vmem>>, vector<8x512xf32>
    %c0_3 = arith.constant 0 : index
    %c0_4 = arith.constant 0 : index
    %2 = vector.load %arg4[%c0_3, %c0_4] : memref<1x512xf32, #tpu.memory_space<vmem>>, vector<1x512xf32>
    %c0_5 = arith.constant 0 : index
    %c0_6 = arith.constant 0 : index
    %3 = vector.load %arg5[%c0_5, %c0_6] : memref<1x512xf32, #tpu.memory_space<vmem>>, vector<1x512xf32>
    %cst = arith.constant dense<0.000000e+00> : vector<8xf32>
    %4 = vector.multi_reduction <add>, %1, %cst [1] : vector<8x512xf32> to vector<8xf32>
    %5 = vector.shape_cast %4 : vector<8xf32> to vector<8x1xf32>
    %cst_7 = arith.constant 5.120000e+02 : f32
    %6 = vector.broadcast %cst_7 : f32 to vector<8x1xf32>
    %7 = arith.divf %5, %6 : vector<8x1xf32>
    %8 = vector.broadcast %7 : vector<8x1xf32> to vector<8x512xf32>
    %9 = arith.subf %1, %8 : vector<8x512xf32>
    %10 = arith.mulf %9, %9 : vector<8x512xf32>
    %cst_8 = arith.constant dense<0.000000e+00> : vector<8xf32>
    %11 = vector.multi_reduction <add>, %10, %cst_8 [1] : vector<8x512xf32> to vector<8xf32>
    %12 = vector.shape_cast %11 : vector<8xf32> to vector<8x1xf32>
    %cst_9 = arith.constant 5.120000e+02 : f32
    %13 = vector.broadcast %cst_9 : f32 to vector<8x1xf32>
    %14 = arith.divf %12, %13 : vector<8x1xf32>
    %cst_10 = arith.constant 9.99999974E-6 : f32
    %15 = vector.broadcast %cst_10 : f32 to vector<8x1xf32>
    %16 = arith.addf %14, %15 : vector<8x1xf32>
    %17 = math.rsqrt %16 : vector<8x1xf32>
    %18 = vector.broadcast %17 : vector<8x1xf32> to vector<8x512xf32>
    %19 = arith.mulf %9, %18 : vector<8x512xf32>
    %20 = vector.broadcast %2 : vector<1x512xf32> to vector<8x512xf32>
    %21 = arith.mulf %19, %20 : vector<8x512xf32>
    %22 = vector.broadcast %3 : vector<1x512xf32> to vector<8x512xf32>
    %23 = arith.addf %21, %22 : vector<8x512xf32>
    %24 = arith.addf %0, %23 : vector<8x512xf32>
    %c0_11 = arith.constant 0 : index
    %c0_12 = arith.constant 0 : index
    %25 = vector.load %arg6[%c0_11, %c0_12] : memref<8x512xf32, #tpu.memory_space<vmem>>, vector<8x512xf32>
    tpu.vector_store %arg6[%c0_11, %c0_12], %24 {strides = array<i32>} : memref<8x512xf32, #tpu.memory_space<vmem>>, vector<8x512xf32>,
    return
  }
  func.func @transform_0(%arg0: i32, %arg1: memref<1xi32, #tpu.memory_space<smem>>) -> (i32, i32) {
    %c0_i32 = arith.constant 0 : i32
    %c0_i32_0 = arith.constant 0 : i32
    return %arg0, %c0_i32 : i32, i32
  }
  func.func @transform_1(%arg0: i32, %arg1: memref<1xi32, #tpu.memory_space<smem>>) -> (i32, i32) {
    %c0_i32 = arith.constant 0 : i32
    %c0_i32_0 = arith.constant 0 : i32
    return %arg0, %c0_i32 : i32, i32
  }
  func.func @transform_2(%arg0: i32, %arg1: memref<1xi32, #tpu.memory_space<smem>>) -> (i32, i32) {
    %c0_i32 = arith.constant 0 : i32
    %c0_i32_0 = arith.constant 0 : i32
    %c0_i32_1 = arith.constant 0 : i32
    return %c0_i32, %c0_i32_0 : i32, i32
  }
  func.func @transform_3(%arg0: i32, %arg1: memref<1xi32, #tpu.memory_space<smem>>) -> (i32, i32) {
    %c0_i32 = arith.constant 0 : i32
    %c0_i32_0 = arith.constant 0 : i32
    %c0_i32_1 = arith.constant 0 : i32
    return %c0_i32, %c0_i32_0 : i32, i32
  }
  func.func @transform_4(%arg0: i32, %arg1: memref<1xi32, #tpu.memory_space<smem>>) -> (i32, i32) {
    %c0_i32 = arith.constant 0 : i32
    %c0_i32_0 = arith.constant 0 : i32
    return %arg0, %c0_i32 : i32, i32
  }
}

</mosaic_0001>

<bundles_post_ra>
// kernel: tpu_custom_call.1
= control target key start
LH: loop header
LB: loop body
LE: loop exit
PB: predicated region body
PF: predicated region fallthrough
CT: control target
= control target key end

     0   :  { %11 = vsyncpa [#allocation5], 0  ;;  %s922_s0 = inlined_call_operand.<no memory space> [shape: s32[1], index: 0, kind: input, shape index: {}]   ;;  %s923_s1 = inlined_call_operand.hbm [shape: f32[16,512], index: 1, kind: input, shape index: {}]   ;;  %s924_s2 = inlined_call_operand.hbm [shape: f32[16,512], index: 2, kind: input, shape index: {}]   ;;  %s925_s3 = inlined_call_operand.vmem [shape: f32[1,512], index: 3, kind: input, shape index: {}]   ;;  %s926_s4 = inlined_call_operand.vmem [shape: f32[1,512], index: 4, kind: input, shape index: {}]   ;;  %s927_s5 = inlined_call_operand.hbm [shape: f32[16,512], index: 5, kind: output, shape index: {}]  }
   0x1   :  { %13 = vsyncpa [#allocation5 + $0x1], 0 }
   0x2   :  { %14 = vsyncpa [#allocation8], 0 }
   0x3   :  { %16 = vsyncpa [#allocation8 + $0x1], 0 }
   0x4   :  { %17 = vsyncpa [#allocation6], 0 }
   0x5   :  { %19 = vsyncpa [#allocation6 + $0x1], 0  ;;  %s696_s0 = smov 0   ;;  %s698_s18 = smov 0  }
   0x6   :  { %s700_s19 = smov 0   ;;  %s702_s20 = smov 0  }
   0x7 LB: > { %s717_s21 = sadd.s32 4294967295, %s661_s20   ;;  %s457_s22 = sadd.s32 4294967294, %s661_s20   ;;  %s661_s20 = sphi %s702_s20, %s946_s20   ;;  %s657_s19 = sphi %s700_s19, %s945_s19   ;;  %s653_s18 = sphi %s698_s18, %s944_s18   ;;  %s649_s0 = sphi %s696_s0, %s943_s0  }
   0x8   : > { %s721_s23 = sadd.s32 1, %s661_s20   ;;  %s32_s24 = sadd.s32 1, %s657_s19 }
   0x9   : > { %s29_s25 = ssub.s32 %s661_s20, %s721_s23  ;;  %p39_p0 = scmp.ne.s32.totalorder %s657_s19, %s653_s18 }
   0xa   : > { %p30_p1 = scmp.eq.s32.totalorder %s29_s25, 0  ;;  %p40_p2 = scmp.eq.s32.totalorder %s661_s20, 0 }
   0xb   : > { %p45_p3 = scmp.ne.s32.totalorder %s653_s18, %s649_s0  ;;  %p46_p4 = scmp.eq.s32.totalorder %s717_s21, 0 }
   0xc   : > { %s733_s26 = scalar_select %p30_p1, %s657_s19, %s32_s24  }
   0xd   : > { %p735_p5 = por %p40_p2, %p39_p0  ;;  %p739_p6 = por %p46_p4, %p45_p3 }
   0xe   : > { %p137_p7 = scmp.eq.s32.totalorder %s717_s21, 1  ;;  %p143_p8 = scmp.eq.s32.totalorder %s457_s22, 1 }
   0xf   : > { %s931_s28 = scalar_select %p739_p6, 1, 0 }
  0x10   : > { %p495_p10 = scmp.lt.s32.totalorder %s661_s20, 2  ;;  %p746_p11 = por %p137_p7, %p39_p0 }
  0x11   : > { %p750_p12 = por %p143_p8, %p45_p3  ;;  %s755_s6 = sand.u32 1, %s657_s19  }
  0x12   : > { %s932_s29 = scalar_select %p746_p11, 1, 0 }
  0x13   : > { %s933_s30 = scalar_select %p750_p12, 1, 0 }
  0x14   : > { %s475_s7 = sshll.u32 %s661_s20, 9  ;;  %s460_s8 = sshll.u32 %s755_s6, 5 }
  0x15   : > { %s764_s11 = scalar_lea.hbm %s923_s1, %s475_s7  ;;  %s173_s12 = scalar_lea.vmem [#allocation4], %s460_s8 }
  0x16   : > { %s181_s13 = sshll.u32 %s173_s12, 4  ;;  %p770_p13 = pnand %p495_p10, %p735_p5  ;;  %s774_s13 = int_to_ptr.vmem [resolvable:$true] %s181_s13 }
  0x17   : > { %s170_s15 = scalar_lea.sflag [#allocation5], %s755_s6  ;;  %s531_s16 = scalar_lea.hbm %s764_s11, 512 }
  0x18   : > { %p532_p2 = scmp.ne.s32.totalorder %s764_s11, %s531_s16  ;;  %p533_p3 = pneg %p770_p13 }
  0x19   : > { %s536_s24 = scalar_lea.hbm %s923_s1, 1024  ;;  %p537_p5 = scmp.lt.u32.totalorder %s764_s11, %s923_s1 }
  0x1a   : > { %p534_p4 = pnand %p533_p3, %p532_p2  ;;  %p538_p8 = scmp.lt.u32.totalorder %s536_s24, %s531_s16 }
  0x1b   : > { %p540_p9 = scmp.lt.u32.totalorder %s531_s16, %s764_s11 }
  0x1c   : > { %p535_p7 = pneg %p534_p4  ;;  %p539_p10 = por %p538_p8, %p537_p5 }
  0x1e   : > { %p541_p0 = por %p540_p9, %p539_p10 }
  0x20   : > { %p542_p1 = pnand %p541_p0, %p535_p7 }
  0x22   : > { %545 = shalt.err (!%p542_p1)
}
  0x23   : > { %s546_s9 = scalar_lea.vmem %s774_s13, 512  ;;  %s663_s10 = smov [#allocation4]  }
  0x24   : > { %p547_p2 = scmp.ne.s32.totalorder %s774_s13, %s546_s9  ;;  %s551_s12 = sshll.u32 %s663_s10, 4  ;;  %s552_s12 = int_to_ptr.vmem [resolvable:$false] %s551_s12 }
  0x25   : > { %s553_s17 = scalar_lea.vmem %s552_s12, 1024  ;;  %p554_p11 = scmp.lt.s32.totalorder %s774_s13, %s552_s12 }
  0x26   : > { %p549_p4 = pnand %p547_p2, %p533_p3  ;;  %p555_p5 = scmp.lt.s32.totalorder %s553_s17, %s546_s9 }
  0x28   : > { %p550_p12 = pneg %p549_p4  ;;  %p556_p8 = por %p555_p5, %p554_p11 }
  0x2a   : > { %p557_p9 = pnand %p556_p8, %p550_p12 }
  0x2c   : > { %560 = shalt.err (!%p557_p9)
}
  0x2d   : > { %487 = dma.hbm_to_vmem [thread:$0]  (!%p770_p13), %s764_s11, 512, %s774_s13, %s170_s15  }
  0x2e   : > { %p935_p0 = scmp.lt.s32.totalorder %s661_s20, 3  ;;  %p936_p1 = scmp.ge.s32.totalorder %s661_s20, 1 }
  0x2f   : > { %s817_s25 = scalar_lea.hbm %s924_s2, %s475_s7  ;;  %s192_s27 = scalar_lea.vmem [#allocation7], %s460_s8 }
  0x30   : > { %p808_p7 = pnand %p936_p1, %p935_p0  ;;  %s200_s9 = sshll.u32 %s192_s27, 4  ;;  %s201_s9 = int_to_ptr.vmem [resolvable:$true] %s200_s9 }
  0x31   : > { %s189_s11 = scalar_lea.sflag [#allocation8], %s755_s6  ;;  %s561_s13 = scalar_lea.hbm %s817_s25, 512 }
  0x32   : > { %s937_s16 = scalar_select %p808_p7, 1, 0 }
  0x33   : > { %p562_p11 = scmp.ne.s32.totalorder %s817_s25, %s561_s13  ;;  %s566_s7 = scalar_lea.hbm %s924_s2, 1024 }
  0x34   : > { %p567_p2 = scmp.lt.u32.totalorder %s817_s25, %s924_s2  ;;  %p568_p4 = scmp.lt.u32.totalorder %s566_s7, %s561_s13 }
  0x35   : > { %p564_p12 = pnand %p562_p11, %p533_p3  ;;  %p570_p8 = scmp.lt.u32.totalorder %s561_s13, %s817_s25 }
  0x36   : > { %p569_p5 = por %p568_p4, %p567_p2 }
  0x37   : > { %p565_p10 = pneg %p564_p12 }
  0x38   : > { %p571_p9 = por %p570_p8, %p569_p5 }
  0x3a   : > { %p572_p0 = pnand %p571_p9, %p565_p10 }
  0x3c   : > { %575 = shalt.err (!%p572_p0)
}
  0x3d   : > { %s576_s6 = scalar_lea.vmem %s201_s9, 512  ;;  %s664_s8 = smov [#allocation7]  }
  0x3e   : > { %p577_p1 = scmp.ne.s32.totalorder %s201_s9, %s576_s6  ;;  %s581_s22 = sshll.u32 %s664_s8, 4  ;;  %s582_s22 = int_to_ptr.vmem [resolvable:$false] %s581_s22 }
  0x3f   : > { %s583_s24 = scalar_lea.vmem %s582_s22, 1024  ;;  %p584_p6 = scmp.lt.s32.totalorder %s201_s9, %s582_s22 }
  0x40   : > { %p579_p11 = pnand %p577_p1, %p533_p3  ;;  %p585_p7 = scmp.lt.s32.totalorder %s583_s24, %s576_s6 }
  0x42   : > { %p580_p12 = pneg %p579_p11  ;;  %p586_p2 = por %p585_p7, %p584_p6 }
  0x44   : > { %p587_p4 = pnand %p586_p2, %p580_p12 }
  0x46   : > { %590 = shalt.err (!%p587_p4)
}
  0x47   : > { %490 = dma.hbm_to_vmem [thread:$0]  (!%p770_p13), %s817_s25, 512, %s201_s9, %s189_s11  }
  0x48   : > { %p938_p10 = scmp.ne.s32.totalorder %s937_s16, 0 }
  0x49   : > { %s844_s27 = sand.u32 (!%p938_p10), 1, %s653_s18   ;;  %p939_p6 = scmp.ne.s32.totalorder (!%p938_p10), %s931_s28, 0 }
  0x4a   : > { %209 = sbr.rel (%p938_p10) target bundleno = 425 (0x1a9), region = 36  ;;  %s847_s13 = sshll.u32 (!%p938_p10), %s844_s27, 5 }
  0x4b   : > { %s212_s15 = scalar_lea.sflag (!%p938_p10), [#allocation5], %s844_s27  ;;  %s851_s10 = scalar_lea.vmem (!%p938_p10), [#allocation4], %s847_s13 }
  0x51   : > { %636 = dma.done.wait (%p939_p6), %s212_s15, 512  }
  0x52   : > { %638 = vsyncadd (%p939_p6), %s212_s15, 4294966784  ;;  %s221_s14 = scalar_lea.sflag [#allocation8], %s844_s27  ;;  %s224_s16 = scalar_lea.vmem [#allocation7], %s847_s13 }
  0x53   : > { %640 = dma.done.wait (%p939_p6), %s221_s14, 512  }
  0x54   : > { %642 = vsyncadd (%p939_p6), %s221_s14, 4294966784  ;;  %v258_v0 = vld [vmem:[%s224_s16] sm:$0xff]  ;;  %v259_v1 = vld [vmem:[%s224_s16 + $0x8] sm:$0xff]  ;;  %v292_v22 = vlaneseq  ;;  %s477_s7 = sshll.u32 %s717_s21, 9  ;;  %s253_s12 = scalar_lea.vmem [#allocation9], %s847_s13 }
  0x55   : > { %v260_v2 = vld [vmem:[%s224_s16 + $0x10] sm:$0xff]  ;;  %v264_v3 = vadd.f32 %v259_v1, %v258_v0  ;;  %v261_v4 = vld [vmem:[%s224_s16 + $0x18] sm:$0xff]  ;;  %v262_v29 = vld [vmem:[%s925_s3] sm:$0xf]  ;;  %s364_s17 = sshll.u32 %s253_s12, 4  ;;  %s878_s22 = scalar_lea.hbm %s927_s5, %s477_s7  ;;  %s880_s17 = int_to_ptr.vmem [resolvable:$true] %s364_s17 }
  0x56   : > { %v293_v24 = vshrl.u32 %v292_v22, 7  ;;  %v263_v30 = vld [vmem:[%s926_s4] sm:$0xf]  ;;  %v255_v49 = vld [vmem:[%s851_s10 + $0x8] sm:$0xff]  ;;  %v256_v50 = vld [vmem:[%s851_s10 + $0x10] sm:$0xff]  ;;  %s350_s21 = scalar_lea.sflag [#allocation6], %s844_s27 }
  0x57   : > { %v265_v5 = vadd.f32 %v264_v3, %v260_v2  ;;  %v254_v44 = vld [vmem:[%s851_s10] sm:$0xff]  ;;  %v257_v51 = vld [vmem:[%s851_s10 + $0x18] sm:$0xff]  ;;  %s591_s24 = scalar_lea.vmem %s880_s17, 512  ;;  %p940_p3 = scmp.ne.s32.totalorder %s932_s29, 0 }
  0x58   : > { %v294_v25 = vsub.s32 0, %v293_v24  ;;  %v298_v26 = vsub.s32 1, %v293_v24  ;;  %v302_v27 = vsub.s32 2, %v293_v24  ;;  %v306_v28 = vsub.s32 3, %v293_v24  ;;  %p592_p13 = scmp.ne.s32.totalorder %s880_s17, %s591_s24  ;;  %s665_s13 = smov [#allocation9]  }
  0x59   : > { %v266_v6 = vadd.f32 %v265_v5, %v261_v4  ;;  %s595_s15 = sshll.u32 %s665_s13, 4  ;;  %s596_s15 = int_to_ptr.vmem [resolvable:$false] %s595_s15 }
  0x5a   : > { %v295_v31 = vrot.slane %v262_v29, %v294_v25  ;;  %v299_v32 = vrot.slane %v262_v29, %v298_v26  ;;  %v303_v33 = vrot.slane %v262_v29, %v302_v27  ;;  %v307_v34 = vrot.slane %v262_v29, %v306_v28  ;;  %p593_p7 = pnand %p592_p13, %p940_p3  ;;  %s597_s10 = scalar_lea.vmem %s596_s15, 1024 }
  0x5b   : > { %267 = vadd.xlane.f32.xlu0 %v266_v6  ;;  %v320_v36 = vrot.slane %v263_v30, %v294_v25  ;;  %v324_v37 = vrot.slane %v263_v30, %v298_v26  ;;  %v328_v38 = vrot.slane %v263_v30, %v302_v27  ;;  %v332_v39 = vrot.slane %v263_v30, %v306_v28  ;;  %p598_p8 = scmp.lt.s32.totalorder %s880_s17, %s596_s15  ;;  %p599_p9 = scmp.lt.s32.totalorder %s597_s10, %s591_s24 }
  0x5c   : > { %p594_p5 = pneg %p593_p7 }
  0x5d   : > { %p600_p0 = por %p599_p9, %p598_p8 }
  0x5f   : > { %p601_p1 = pnand %p600_p0, %p594_p5 }
  0xe8   : > { %v268_v7 = vpop.xlane.xlu0 %267 }
  0xe9   : > { %v270_v8 = vmul.f32 0.001953125, %v268_v7 }
  0xeb   : > { %v271_v9 = vsub.f32 %v258_v0, %v270_v8  ;;  %v272_v10 = vsub.f32 %v259_v1, %v270_v8  ;;  %v273_v11 = vsub.f32 %v260_v2, %v270_v8  ;;  %v274_v12 = vsub.f32 %v261_v4, %v270_v8 }
  0xed   : > { %v275_v13 = vmul.f32 %v271_v9, %v271_v9  ;;  %v276_v14 = vmul.f32 %v272_v10, %v272_v10  ;;  %v277_v15 = vmul.f32 %v273_v11, %v273_v11  ;;  %v278_v17 = vmul.f32 %v274_v12, %v274_v12 }
  0xef   : > { %v279_v16 = vadd.f32 %v276_v14, %v275_v13 }
  0xf1   : > { %v280_v18 = vadd.f32 %v279_v16, %v277_v15 }
  0xf3   : > { %v281_v19 = vadd.f32 %v280_v18, %v278_v17 }
  0xf5   : > { %282 = vadd.xlane.f32.xlu0 %v281_v19 }
 0x182   : > { %v283_v20 = vpop.xlane.xlu0 %282 }
 0x183   : > { %v284_v21 = vmul.f32 0.001953125, %v283_v20 }
 0x185   : > { %v285_v23 = vadd.f32 1e-05, %v284_v21 }
 0x187   : > { %529 = vrsqrt.f32 %v285_v23 }
 0x191   : > { %v530_v35 = vpop.eup %529 }
 0x192   : > { %v287_v40 = vmul.f32 %v530_v35, %v271_v9  ;;  %v288_v41 = vmul.f32 %v530_v35, %v272_v10  ;;  %v289_v42 = vmul.f32 %v530_v35, %v273_v11  ;;  %v290_v43 = vmul.f32 %v530_v35, %v274_v12 }
 0x194   : > { %v312_v45 = vmul.f32 %v295_v31, %v287_v40  ;;  %v313_v46 = vmul.f32 %v299_v32, %v288_v41  ;;  %v314_v47 = vmul.f32 %v303_v33, %v289_v42  ;;  %v315_v48 = vmul.f32 %v307_v34, %v290_v43 }
 0x196   : > { %v337_v52 = vadd.f32 %v320_v36, %v312_v45  ;;  %v338_v53 = vadd.f32 %v324_v37, %v313_v46  ;;  %v339_v54 = vadd.f32 %v328_v38, %v314_v47  ;;  %v340_v55 = vadd.f32 %v332_v39, %v315_v48 }
 0x198   : > { %v341_v56 = vadd.f32 %v337_v52, %v254_v44  ;;  %v342_v57 = vadd.f32 %v338_v53, %v255_v49  ;;  %v343_v58 = vadd.f32 %v339_v54, %v256_v50  ;;  %v344_v59 = vadd.f32 %v340_v55, %v257_v51 }
 0x19a   : > { %345 = vst [vmem:[%s253_s12] sm:$0xff] %v341_v56  ;;  %346 = vst [vmem:[%s253_s12 + $0x8] sm:$0xff] %v342_v57 }
 0x19b   : > { %347 = vst [vmem:[%s253_s12 + $0x10] sm:$0xff] %v343_v58  ;;  %348 = vst [vmem:[%s253_s12 + $0x18] sm:$0xff] %v344_v59 }
 0x19c   : > { %604 = shalt.err (!%p601_p1)
}
 0x19d   : > { %s605_s27 = scalar_lea.hbm %s878_s22, 512  ;;  %s609_s28 = scalar_lea.hbm %s927_s5, 1024 }
 0x19e   : > { %p606_p11 = scmp.ne.s32.totalorder %s878_s22, %s605_s27  ;;  %p610_p4 = scmp.lt.u32.totalorder %s878_s22, %s927_s5 }
 0x19f   : > { %p611_p10 = scmp.lt.u32.totalorder %s609_s28, %s605_s27  ;;  %p613_p13 = scmp.lt.u32.totalorder %s605_s27, %s878_s22 }
 0x1a0   : > { %p607_p12 = pnand %p606_p11, %p940_p3 }
 0x1a1   : > { %p612_p6 = por %p611_p10, %p610_p4 }
 0x1a2   : > { %p608_p2 = pneg %p607_p12 }
 0x1a3   : > { %p614_p7 = por %p613_p13, %p612_p6 }
 0x1a5   : > { %p615_p5 = pnand %p614_p7, %p608_p2 }
 0x1a7   : > { %618 = shalt.err (!%p615_p5)
}
 0x1a8   : > { %482 = dma.vmem_to_hbm [thread:$0]  (%p940_p3), %s880_s17, 512, %s878_s22, %s350_s21  }
 0x1a9 PF: > { %s376_s11 = sand.u32 1, %s649_s0   ;;  %p941_p8 = scmp.ne.s32.totalorder %s933_s30, 0 }
 0x1aa   : > { %p942_p9 = scmp.ge.s32.totalorder %s661_s20, 2  ;;  %s377_s7 = scalar_lea.sflag [#allocation6], %s376_s11 }
 0x1ac   : > { %p492_p0 = pnand %p942_p9, %p941_p8 }
 0x1ae   : > { %644 = dma.done.wait (!%p492_p0), %s377_s7, 512  }
 0x1af   : > { %646 = vsyncadd (!%p492_p0), %s377_s7, 4294966784  ;;  %p22_p1 = scmp.ge.s32.totalorder %s721_s23, 4   ;;  %s943_s0 = smov %s653_s18 }
 0x1b0   : > { %s944_s18 = smov %s657_s19  ;;  %s945_s19 = smov %s733_s26 }
 0x1b1   : > { %s946_s20 = smov %s721_s23  ;;  %24 = sbr.rel (!%p22_p1) target bundleno = 7 (0x7), region = 94 }
 0x1b8   :  { %382 = vsyncpa [#allocation5], 1 }
 0x1b9   :  { %384 = vsyncpa [#allocation5 + $0x1], 1 }
 0x1ba   :  { %385 = vsyncpa [#allocation8], 1 }
 0x1bb   :  { %387 = vsyncpa [#allocation8 + $0x1], 1 }
 0x1bc   :  { %388 = vsyncpa [#allocation6], 1 }
 0x1bd   :  { %390 = vsyncpa [#allocation6 + $0x1], 1 }

</bundles_post_ra>
